<compile_context>
chip_gen: v5e
topology: v5e:2x2
jax: 0.10.0
libtpu: 0.0.40
codegen_flags: <defaults>
</compile_context>

<pallas_src>
import functools

import numpy as np

import jax
import jax.numpy as jnp
from jax.experimental import pallas as pl
from jax.experimental.pallas import tpu as pltpu


def _sublane_multiple(itemsize):
    # f32 -> 8 rows / vreg, bf16 -> 16, int8/fp8 -> 32.
    return {4: 8, 2: 16, 1: 32}.get(itemsize, 8)


def _vmem_capacity_bytes():
    try:
        return int(pltpu.get_tpu_info().vmem_capacity_bytes)
    except Exception:
        return 64 * 1024 * 1024  # conservative default (v7x per-core capacity)


def eca_kernel(x_ref, hm_ref, w_ref, b_ref, o_ref, mext_ref, *,
               hw, C, TC, pad, nct, use_halo, mask_ragged):
    # x_ref   : (1, TC, HW) VMEM tile (one batch element, one channel tile)
    # hm_ref  : (B*nct*2*pad,) f32 SMEM halo-channel means (dummy (1,) when unused)
    # w_ref   : (K,) f32 SMEM conv taps;  b_ref: (1,) f32 SMEM conv bias
    # mext_ref: (TC + 2*pad, 1) f32 VMEM scratch -- halo-extended pooled means
    bi = pl.program_id(0)
    ti = pl.program_id(1)
    K = w_ref.shape[0]

    x = x_ref[0]                                                    # (TC, HW)

    # --- global average pool over the (lane) spatial axis, f32 accumulate ---
    # (HW per tile is bounded by the VMEM budget, so a single-pass f32 sum is fine.)
    m = jnp.sum(x.astype(jnp.float32), axis=1, keepdims=True) * (1.0 / hw)  # (TC,1)

    if mask_ragged:
        # Channels beyond the true channel count (ragged last tile) must act like
        # the conv's zero padding; they only ever see Pallas' OOB-pad data, which
        # this mask selects away from (so NaN/Inf in the pad region is contained).
        cidx = jax.lax.broadcasted_iota(jnp.int32, (TC, 1), 0) + ti * TC
        m = jnp.where(cidx < C, m, 0.0)

    # --- build halo-extended mean vector in scratch: [left pad | m | right pad] ---
    mext_ref[pl.ds(pad, TC), :] = m
    if pad > 0:
        if use_halo:
            hbase = (bi * nct + ti) * (2 * pad)
            for j in range(pad):
                mext_ref[pl.ds(j, 1), :] = jnp.full(
                    (1, 1), hm_ref[hbase + j], jnp.float32)
                mext_ref[pl.ds(pad + TC + j, 1), :] = jnp.full(
                    (1, 1), hm_ref[hbase + pad + j], jnp.float32)
        else:
            # Single channel tile: the conv's zero padding.
            mext_ref[pl.ds(0, pad), :] = jnp.zeros((pad, 1), jnp.float32)
            mext_ref[pl.ds(pad + TC, pad), :] = jnp.zeros((pad, 1), jnp.float32)

    # --- K-tap 1-D conv along channels: K shifted window reads (no matmul) ---
    y = jnp.full((TC, 1), b_ref[0], jnp.float32)
    for t in range(K):
        y = y + w_ref[t] * mext_ref[pl.ds(t, TC), :]

    # --- sigmoid gate + per-channel scaling, multiply/store in input dtype ---
    a = jax.nn.sigmoid(y)                                           # (TC, 1) f32
    o_ref[0] = (x * a.astype(x.dtype)).astype(o_ref.dtype)


def gate_kernel(x_ref, g_ref, o_ref):
    # Large-HW fallback: x_ref (1, TC, THW); g_ref (1, TC, 1) f32 per-channel gate.
    o_ref[0] = (x_ref[0] * g_ref[0].astype(x_ref.dtype)).astype(o_ref.dtype)


def _plan_channel_tile(B, C, HW, itemsize, vmem_cap):
    """Channel tile + tile count for the fused kernel.

    Returns (TC, nct, tile_budget); TC is None when even `sub` channel rows exceed
    the tile budget (huge feature maps) -- the caller then takes the two-pass path.
    """
    sub = _sublane_multiple(itemsize)
    # ~8 MiB tiles amortize the per-step grid overhead; live VMEM is about
    # 2 x (in + out) tiles (double buffering), kept well under the per-core VMEM.
    tile_budget = min(8 * 1024 * 1024, int(vmem_cap * 0.7) // 4)
    row_bytes = HW * itemsize
    tc = (tile_budget // max(1, row_bytes)) // sub * sub
    if tc < sub:
        return None, None, tile_budget          # large-HW fallback
    if tc >= C:
        tc, nct = C, 1
    else:
        nct = -(-C // tc)
    # Keep >= 2 parallel grid steps so both TensorCores (v7x) get work.
    if B == 1 and nct == 1 and C >= 2 * sub:
        half = -(-C // 2)
        tc2 = -(-half // sub) * sub
        if tc2 < C:
            tc, nct = tc2, -(-C // tc2)
    return tc, nct, tile_budget


def _eca_large_hw(x2, w32, b32, pad, itemsize, tile_budget, vmem_cap):
    """Two-pass path for feature maps too large for a few channel rows per tile:
    per-channel means + the tiny K-tap channel conv + sigmoid in plain JAX, then a
    Pallas gating kernel streams x tiled over both C and HW."""
    B, C, HW = x2.shape
    K = w32.shape[0]
    sub = _sublane_multiple(itemsize)

    m = jnp.mean(x2, axis=-1, dtype=jnp.float32)                    # (B, C)
    mp = jnp.pad(m, ((0, 0), (pad, pad)))
    y = b32[0] + sum(w32[t] * mp[:, t:t + C] for t in range(K))
    g = jax.nn.sigmoid(y)[:, :, None]                               # (B, C, 1) f32

    TC = C if C < sub else sub
    thw = (tile_budget // max(1, TC * itemsize)) // 128 * 128
    thw = max(128, thw)
    if thw >= HW:
        thw = HW
    nct = -(-C // TC)
    nht = -(-HW // thw)

    tile_bytes = TC * thw * itemsize
    vmem_limit = int(min(vmem_cap, max(32 << 20, 4 * tile_bytes + (16 << 20))))

    return pl.pallas_call(
        gate_kernel,
        out_shape=jax.ShapeDtypeStruct((B, C, HW), x2.dtype),
        grid=(B, nct, nht),
        in_specs=[
            pl.BlockSpec((1, TC, thw), lambda bi, ci, hi: (bi, ci, hi)),
            pl.BlockSpec((1, TC, 1), lambda bi, ci, hi: (bi, ci, 0)),
        ],
        out_specs=pl.BlockSpec((1, TC, thw), lambda bi, ci, hi: (bi, ci, hi)),
        compiler_params=pltpu.CompilerParams(
            dimension_semantics=("parallel", "parallel", "parallel"),
            vmem_limit_bytes=vmem_limit),
        cost_estimate=pl.CostEstimate(
            flops=B * C * HW, transcendentals=B * C,
            bytes_accessed=2 * B * C * HW * itemsize + B * C * 4),
    )(x2, g)


@jax.jit
def eca_attention(x, w, b):
    """ECA forward.  x: (B, C, H, W); w: (K,) Conv1d taps; b: (1,) Conv1d bias."""
    B, C, H, W = x.shape
    HW = H * W
    K = w.shape[0]
    pad = (K - 1) // 2
    itemsize = x.dtype.itemsize

    w32 = w.astype(jnp.float32)            # SMEM scalar handling is 32-bit
    b32 = b.astype(jnp.float32)
    x2 = x.reshape(B, C, HW)               # layout-preserving view, no HBM copy

    vmem_cap = _vmem_capacity_bytes()
    TC, nct, tile_budget = _plan_channel_tile(B, C, HW, itemsize, vmem_cap)

    if TC is None:
        out = _eca_large_hw(x2, w32, b32, pad, itemsize, tile_budget, vmem_cap)
        return out.reshape(B, C, H, W)

    use_halo = (pad > 0) and (nct > 1)
    if use_halo:
        # Neighbor-channel ("halo") means adjacent tiles need, from a negligible
        # slice of x (2*pad rows per tile); zero outside [0, C).
        tiles = np.arange(nct)[:, None]
        left = tiles * TC - pad + np.arange(pad)[None, :]           # (nct, pad)
        right = tiles * TC + TC + np.arange(pad)[None, :]           # (nct, pad)
        halo_ch = np.concatenate([left, right], axis=1).reshape(-1)
        valid = ((halo_ch >= 0) & (halo_ch < C)).astype(np.float32)
        halo_ch = np.clip(halo_ch, 0, C - 1)
        hm = jnp.mean(x2[:, halo_ch, :].astype(jnp.float32), axis=-1)  # (B, nct*2*pad)
        hm_flat = (hm * jnp.asarray(valid)[None, :]).reshape(-1)
    else:
        hm_flat = jnp.zeros((1,), jnp.float32)                      # dummy SMEM input

    kernel = functools.partial(
        eca_kernel, hw=HW, C=C, TC=TC, pad=pad, nct=nct,
        use_halo=use_halo, mask_ragged=(nct * TC != C))

    tile_bytes = TC * HW * itemsize
    scratch_bytes = (TC + 2 * pad + 8) * 128 * 4                    # lane-padded f32
    vmem_limit = int(min(
        vmem_cap, max(32 << 20, 4 * tile_bytes + scratch_bytes + (16 << 20))))

    out = pl.pallas_call(
        kernel,
        out_shape=jax.ShapeDtypeStruct((B, C, HW), x.dtype),
        grid=(B, nct),
        in_specs=[
            pl.BlockSpec((1, TC, HW), lambda bi, ti: (bi, ti, 0)),
            pl.BlockSpec(memory_space=pltpu.MemorySpace.SMEM),
            pl.BlockSpec(memory_space=pltpu.MemorySpace.SMEM),
            pl.BlockSpec(memory_space=pltpu.MemorySpace.SMEM),
        ],
        out_specs=pl.BlockSpec((1, TC, HW), lambda bi, ti: (bi, ti, 0)),
        scratch_shapes=[pltpu.VMEM((TC + 2 * pad, 1), jnp.float32)],
        compiler_params=pltpu.CompilerParams(
            dimension_semantics=("parallel", "parallel"),
            vmem_limit_bytes=vmem_limit),
        cost_estimate=pl.CostEstimate(
            flops=2 * B * C * HW,
            transcendentals=B * C,
            bytes_accessed=2 * B * C * HW * itemsize),
    )(x2, hm_flat, w32, b32)

    return out.reshape(B, C, H, W)


def eca_reference(x, w, b):
    """Pure-JAX reference matching the PyTorch forward."""
    K = w.shape[0]
    pad = (K - 1) // 2
    C = x.shape[1]
    m = x.astype(jnp.float32).mean(axis=(2, 3))                     # (B, C)
    mp = jnp.pad(m, ((0, 0), (pad, pad)))                           # zero-padded channels
    y = b[0] + sum(w[t] * mp[:, t:t + C] for t in range(K))
    a = jax.nn.sigmoid(y)
    return (x * a[:, :, None, None].astype(x.dtype)).astype(x.dtype)


if __name__ == "__main__":
    key = jax.random.PRNGKey(0)
    kx, kw, kb, kx2 = jax.random.split(key, 4)

    kernel_size = 3
    # Deterministic Conv1d(1, 1, K) parameter init (PyTorch default: U(-1/sqrt(K), 1/sqrt(K))).
    bound = 1.0 / (1 * kernel_size) ** 0.5
    w = jax.random.uniform(kw, (kernel_size,), jnp.float32, -bound, bound)
    b = jax.random.uniform(kb, (1,), jnp.float32, -bound, bound)

    # Case 1: module-sized input (batch=2, channels=4, spatial=16x16) -- single
    # channel tile, no halo precompute, no pad/slice copies.
    x = jax.random.normal(kx, (2, 4, 16, 16), dtype=jnp.float32)
    out = jax.block_until_ready(eca_attention(x, w, b))
    ref = eca_reference(x, w, b)
    assert out.shape == x.shape and out.dtype == x.dtype
    assert jnp.allclose(out, ref, atol=1e-5, rtol=1e-5)

    # Case 2: B=1 forces a 2-way channel split (both v7x TensorCores get a grid
    # step) and exercises the multi-tile halo path.
    x2 = jax.random.normal(kx2, (1, 32, 16, 16), dtype=jnp.float32)
    out2 = jax.block_until_ready(eca_attention(x2, w, b))
    ref2 = eca_reference(x2, w, b)
    assert out2.shape == x2.shape and out2.dtype == x2.dtype
    assert jnp.allclose(out2, ref2, atol=1e-5, rtol=1e-5)

    print("KERNEL_OK")
</pallas_src>

<mosaic_0001>
module attributes {stable_mosaic.version = 11 : i64} {
  func.func @eca_kernel(%arg0: i32, %arg1: i32, %arg2: memref<1x4x256xf32, #tpu.memory_space<vmem>>, %arg3: memref<1xf32, #tpu.memory_space<smem>>, %arg4: memref<3xf32, #tpu.memory_space<smem>>, %arg5: memref<1xf32, #tpu.memory_space<smem>>, %arg6: memref<1x4x256xf32, #tpu.memory_space<vmem>>, %arg7: memref<6x1xf32, #tpu.memory_space<vmem>>) attributes {dimension_semantics = [#tpu.dimension_semantics<parallel>, #tpu.dimension_semantics<parallel>], iteration_bounds = array<i64: 2, 1>, scalar_prefetch = 0 : i64, scratch_operands = 1 : i64, tpu.core_type = #tpu.core_type<tc>, window_params = [{transform_indices = @transform_0, window_bounds = array<i64: 1, 4, 256>}, {transform_indices = @transform_1, window_bounds = array<i64: 1>}, {transform_indices = @transform_2, window_bounds = array<i64: 3>}, {transform_indices = @transform_3, window_bounds = array<i64: 1>}, {transform_indices = @transform_4, window_bounds = array<i64: 1, 4, 256>}]} {
    %c0 = arith.constant 0 : index
    %c0_0 = arith.constant 0 : index
    %c0_1 = arith.constant 0 : index
    %0 = vector.load %arg2[%c0, %c0_0, %c0_1] : memref<1x4x256xf32, #tpu.memory_space<vmem>>, vector<1x4x256xf32>
    %1 = vector.shape_cast %0 : vector<1x4x256xf32> to vector<4x256xf32>
    %cst = arith.constant dense<0.000000e+00> : vector<4xf32>
    %2 = vector.multi_reduction <add>, %1, %cst [1] : vector<4x256xf32> to vector<4xf32>
    %3 = vector.shape_cast %2 : vector<4xf32> to vector<4x1xf32>
    %cst_2 = arith.constant 3.906250e-03 : f32
    %4 = vector.broadcast %cst_2 : f32 to vector<4x1xf32>
    %5 = arith.mulf %3, %4 : vector<4x1xf32>
    %c1 = arith.constant 1 : index
    %c0_3 = arith.constant 0 : index
    %6 = vector.load %arg7[%c1, %c0_3] : memref<6x1xf32, #tpu.memory_space<vmem>>, vector<4x1xf32>
    tpu.vector_store %arg7[%c1, %c0_3], %5 {strides = array<i32>} : memref<6x1xf32, #tpu.memory_space<vmem>>, vector<4x1xf32>,
    %cst_4 = arith.constant 0.000000e+00 : f32
    %7 = vector.broadcast %cst_4 : f32 to vector<1x1xf32>
    %c0_5 = arith.constant 0 : index
    %c0_6 = arith.constant 0 : index
    %8 = vector.load %arg7[%c0_5, %c0_6] : memref<6x1xf32, #tpu.memory_space<vmem>>, vector<1x1xf32>
    tpu.vector_store %arg7[%c0_5, %c0_6], %7 {strides = array<i32>} : memref<6x1xf32, #tpu.memory_space<vmem>>, vector<1x1xf32>,
    %cst_7 = arith.constant 0.000000e+00 : f32
    %9 = vector.broadcast %cst_7 : f32 to vector<1x1xf32>
    %c5 = arith.constant 5 : index
    %c0_8 = arith.constant 0 : index
    %10 = vector.load %arg7[%c5, %c0_8] : memref<6x1xf32, #tpu.memory_space<vmem>>, vector<1x1xf32>
    tpu.vector_store %arg7[%c5, %c0_8], %9 {strides = array<i32>} : memref<6x1xf32, #tpu.memory_space<vmem>>, vector<1x1xf32>,
    %c0_9 = arith.constant 0 : index
    %11 = memref.load %arg5[%c0_9] : memref<1xf32, #tpu.memory_space<smem>>
    %12 = vector.broadcast %11 : f32 to vector<4x1xf32>
    %c0_10 = arith.constant 0 : index
    %13 = memref.load %arg4[%c0_10] : memref<3xf32, #tpu.memory_space<smem>>
    %c0_11 = arith.constant 0 : index
    %c0_12 = arith.constant 0 : index
    %14 = vector.load %arg7[%c0_11, %c0_12] : memref<6x1xf32, #tpu.memory_space<vmem>>, vector<4x1xf32>
    %15 = vector.broadcast %13 : f32 to vector<4x1xf32>
    %16 = arith.mulf %15, %14 : vector<4x1xf32>
    %17 = arith.addf %12, %16 : vector<4x1xf32>
    %c1_13 = arith.constant 1 : index
    %18 = memref.load %arg4[%c1_13] : memref<3xf32, #tpu.memory_space<smem>>
    %c1_14 = arith.constant 1 : index
    %c0_15 = arith.constant 0 : index
    %19 = vector.load %arg7[%c1_14, %c0_15] : memref<6x1xf32, #tpu.memory_space<vmem>>, vector<4x1xf32>
    %20 = vector.broadcast %18 : f32 to vector<4x1xf32>
    %21 = arith.mulf %20, %19 : vector<4x1xf32>
    %22 = arith.addf %17, %21 : vector<4x1xf32>
    %c2 = arith.constant 2 : index
    %23 = memref.load %arg4[%c2] : memref<3xf32, #tpu.memory_space<smem>>
    %c2_16 = arith.constant 2 : index
    %c0_17 = arith.constant 0 : index
    %24 = vector.load %arg7[%c2_16, %c0_17] : memref<6x1xf32, #tpu.memory_space<vmem>>, vector<4x1xf32>
    %25 = vector.broadcast %23 : f32 to vector<4x1xf32>
    %26 = arith.mulf %25, %24 : vector<4x1xf32>
    %27 = arith.addf %22, %26 : vector<4x1xf32>
    %28 = arith.negf %27 : vector<4x1xf32>
    %29 = math.exp %28 : vector<4x1xf32>
    %cst_18 = arith.constant 1.000000e+00 : f32
    %30 = vector.broadcast %cst_18 : f32 to vector<4x1xf32>
    %31 = arith.addf %30, %29 : vector<4x1xf32>
    %32 = arith.divf %30, %31 : vector<4x1xf32>
    %33 = vector.broadcast %32 : vector<4x1xf32> to vector<4x256xf32>
    %34 = arith.mulf %1, %33 : vector<4x256xf32>
    %c0_19 = arith.constant 0 : index
    %c0_20 = arith.constant 0 : index
    %c0_21 = arith.constant 0 : index
    %35 = vector.load %arg6[%c0_19, %c0_20, %c0_21] : memref<1x4x256xf32, #tpu.memory_space<vmem>>, vector<1x4x256xf32>
    %36 = vector.shape_cast %35 : vector<1x4x256xf32> to vector<4x256xf32>
    %37 = vector.shape_cast %34 : vector<4x256xf32> to vector<1x4x256xf32>
    tpu.vector_store %arg6[%c0_19, %c0_20, %c0_21], %37 {strides = array<i32>} : memref<1x4x256xf32, #tpu.memory_space<vmem>>, vector<1x4x256xf32>,
    return
  }
  func.func @transform_0(%arg0: i32, %arg1: i32) -> (i32, i32, i32) {
    %c0_i32 = arith.constant 0 : i32
    %c0_i32_0 = arith.constant 0 : i32
    return %arg0, %arg1, %c0_i32 : i32, i32, i32
  }
  func.func @transform_1(%arg0: i32, %arg1: i32) -> i32 {
    %c0_i32 = arith.constant 0 : i32
    %c0_i32_0 = arith.constant 0 : i32
    return %c0_i32 : i32
  }
  func.func @transform_2(%arg0: i32, %arg1: i32) -> i32 {
    %c0_i32 = arith.constant 0 : i32
    %c0_i32_0 = arith.constant 0 : i32
    return %c0_i32 : i32
  }
  func.func @transform_3(%arg0: i32, %arg1: i32) -> i32 {
    %c0_i32 = arith.constant 0 : i32
    %c0_i32_0 = arith.constant 0 : i32
    return %c0_i32 : i32
  }
  func.func @transform_4(%arg0: i32, %arg1: i32) -> (i32, i32, i32) {
    %c0_i32 = arith.constant 0 : i32
    %c0_i32_0 = arith.constant 0 : i32
    return %arg0, %arg1, %c0_i32 : i32, i32, i32
  }
}

</mosaic_0001>

<bundles_post_ra>
// kernel: eca_attention.1
= control target key start
LH: loop header
LB: loop body
LE: loop exit
PB: predicated region body
PF: predicated region fallthrough
CT: control target
= control target key end

     0   :  { %s601_s0 = inlined_call_operand.vmem [shape: f32[2,4,256], index: 0, kind: input, shape index: {}]   ;;  %s602_s1 = inlined_call_operand.<no memory space> [shape: f32[1], index: 1, kind: input, shape index: {}]   ;;  %s603_s2 = inlined_call_operand.vmem [shape: f32[3], index: 2, kind: input, shape index: {}]   ;;  %s604_s3 = inlined_call_operand.<no memory space> [shape: f32[1], index: 3, kind: input, shape index: {}]   ;;  %s605_s4 = inlined_call_operand.vmem [shape: f32[2,4,256], index: 4, kind: output, shape index: {}]  }
   0x1   :  { %10 = sst [smem:[#allocation4]] %s604_s3 }
   0x2   :  { %11 = vsyncpa [#allocation6], 0  ;;  %s557_s17 = smov 0   ;;  %s559_s18 = smov 0  }
   0x3   :  { %s561_s19 = smov 0  }
   0x4 LB: > { %s421_s1 = sadd.s32 4294967295, %s523_s19   ;;  %s29_s3 = sadd.s32 1, %s519_s18  ;;  %s523_s19 = sphi %s561_s19, %s17_s19   ;;  %s519_s18 = sphi %s559_s18, %s607_s18   ;;  %s515_s17 = sphi %s557_s17, %s606_s17  }
   0x5   : > { %p31_p0 = scmp.ge.s32.totalorder %s29_s3, 2  ;;  %p423_p1 = scmp.ge.s32.totalorder %s523_s19, 1 }
   0x6   : > { %p153_p2 = scmp.lt.s32.totalorder %s523_s19, 3  ;;  %p447_p4 = scmp.eq.s32.totalorder %s421_s1, 0 }
   0x7   : > { %s609_s3 = smov (%p31_p0, %s29_s3), 0  ;;  %s168_s22 = sshll.u32 %s603_s2, 4  ;;  %s169_s22 = int_to_ptr.vmem [resolvable:$true] %s168_s22 }
   0x8   : > { %p154_p3 = pnand %p423_p1, %p153_p2  ;;  %s525_s23 = smov [#allocation5]  }
   0xa   : > { %p443_p5 = pneg %p154_p3  ;;  %196 = sbr.rel (%p154_p3) target bundleno = 317 (0x13d), region = 36 }
   0xc   : > { %p444_p6 = pnand %p447_p4, %p443_p5 }
   0xe   : > { %446 = dma.vmem_to_smem (!%p444_p6), %s169_s22, 16, %s525_s23, [#allocation6]  }
   0xf   : > { %510 = dma.done.wait (%p447_p4), [#allocation6], 16  }
  0x10   : > { %512 = vsyncadd (%p447_p4), [#allocation6], 4294967280 }
  0x11   : > { %203 = sfence }
  0x12   : > { %p232_p7 = scmp.lt.s32.totalorder %s515_s17, 1  ;;  %vm257_vm0 = vcmask 1043456   ;;  %vm266_vm1 = vcmask 0   ;;  %v526_v6 = vmov 0.0   ;;  %v527_v7 = vmov 0   ;;  %s271_s28 = sld [smem:[#allocation5]] }
  0x13   : > { %267 = vst.msk [vmem:[#allocation2] sm:$0x1] %vm266_vm1, %v526_v6  ;;  %477 = vset.pattern.permute.xlu0 %v527_v7  ;;  %vm264_vm2 = vcmask 3072   ;;  %s269_s29 = sld [smem:[#allocation4]]  ;;  %v528_v36 = vmov 839922192  }
  0x14   : > { %s611_s17 = smov (!%p232_p7, %s515_s17), 1  ;;  %268 = vst.msk [vmem:[#allocation2 + $0x5] sm:$0x1] %vm266_vm1, %v526_v6  ;;  %s432_s30 = sld [smem:[#allocation5 + $0x1]]  ;;  %v310_v37 = vunpack.c.l.s4 %v528_v36 }
  0x15   : > { %s437_s24 = sshll.u32 %s611_s17, 3  ;;  %s433_s5 = sld [smem:[#allocation5 + $0x2]] }
  0x16   : > { %s240_s27 = scalar_lea.vmem %s601_s0, %s437_s24  ;;  %v311_v38 = vunpack.c.0.s8 %v310_v37  ;;  %s249_s8 = scalar_lea.vmem %s605_s4, %s437_s24 }
  0x17   : > { %v250_v0 = vld [vmem:[%s240_s27] sm:$0xff] }
  0x18   : > { %252 = vst [vmem:[#allocation1] ss:$2 sm:$0xff] %v250_v0  ;;  %v273_v10 = vstv %s271_s28 }
  0x19   : > { %v270_v11 = vstv %s269_s29 }
  0x1a   : > { %v278_v14 = vstv %s432_s30 }
  0x1b   : > { %v283_v17 = vstv %s433_s5 }
  0x1f   : > { %v253_v1 = vld.sshfl [vmem:[#allocation1] sm:$0xff pattern:$0x75316420]  ;;  %v254_v2 = vld.sshfl [vmem:[#allocation1 + $0x8] sm:$0xff pattern:$0x75316420] }
  0x20   : > { %v258_v3 = vsel %vm257_vm0, %v253_v1, 0.0  ;;  %v259_v4 = vsel %vm257_vm0, %v254_v2, 0.0 }
  0x21   : > { %v260_v5 = vadd.f32 %v259_v4, %v258_v3 }
  0x23   : > { %261 = vadd.xlane.f32.xlu0 %v260_v5 }
  0x96   : > { %v262_v8 = vpop.xlane.xlu0 %261 }
  0x97   : > { %v263_v9 = vmul.f32 0.00390625, %v262_v8 }
  0x99   : > { %265 = vst.msk [vmem:[#allocation2 + $0x1] sm:$0xf] %vm264_vm2, %v263_v9 }
  0xa0   : > { %v272_v12 = vld [vmem:[#allocation2] sm:$0xf] }
  0xa1   : > { %v277_v13 = vld [vmem:[#allocation2 + $0x1] sm:$0xf]  ;;  %v274_v15 = vmul.f32 %v273_v10, %v272_v12 }
  0xa2   : > { %v282_v16 = vld [vmem:[#allocation2 + $0x2] sm:$0xf]  ;;  %v279_v19 = vmul.f32 %v278_v14, %v277_v13 }
  0xa3   : > { %v275_v18 = vadd.f32 %v274_v15, %v270_v11  ;;  %v284_v21 = vmul.f32 %v283_v17, %v282_v16 }
  0xa5   : > { %v280_v20 = vadd.f32 %v279_v19, %v275_v18 }
  0xa7   : > { %v285_v22 = vadd.f32 %v284_v21, %v280_v20 }
  0xa9   : > { %v434_v23 = vmul.f32 -1.442695, %v285_v22 }
  0xab   : > { %478 = vpow2.f32 %v434_v23 }
  0xb1   : > { %v479_v24 = vpop.eup %478 }
  0xb2   : > { %v289_v25 = vadd.f32 1.0, %v479_v24 }
  0xb4   : > { %480 = vrcp.f32 %v289_v25  ;;  %v301_v29 = vand.u32 2147483648, %v289_v25  ;;  %v299_v31 = vand.u32 2147483647, %v289_v25  ;;  %vm295_vm4 = vweird.f32 %v289_v25 }
  0xb6   : > { %v302_v33 = vor.u32 1.1754944e-38, %v301_v29  ;;  %vm300_vm6 = vcmp.eq.f32.partialorder %v299_v31, 8.507059e+37 }
  0xba   : > { %v481_v26 = vpop.eup %480 }
  0xbb   : > { %v291_v27 = vmul.f32 %v481_v26, %v289_v25  ;;  %vm296_vm3 = vweird.f32 %v481_v26 }
  0xbc   : > { %vm297_vm5 = vmor %vm295_vm4, %vm296_vm3 }
  0xbd   : > { %v292_v28 = vsub.f32 1.0, %v291_v27 }
  0xbf   : > { %v293_v30 = vmul.f32 %v481_v26, %v292_v28 }
  0xc1   : > { %v294_v32 = vadd.f32 %v481_v26, %v293_v30 }
  0xc3   : > { %v298_v34 = vsel %vm297_vm5, %v481_v26, %v294_v32 }
  0xc4   : > { %v303_v35 = vsel %vm300_vm6, %v302_v33, %v298_v34 }
  0xc5   : > { %307 = vperm.xlu0 %477, %v303_v35  }
 0x137   : > { %v308_v39 = vpop.permute.xlu0 %307 }
 0x138   : > { %v312_v40 = vperm.slane %v308_v39, %v311_v38 }
 0x13a   : > { %v314_v41 = vmul.f32 %v312_v40, %v250_v0 }
 0x13c   : > { %315 = vst [vmem:[%s249_s8] sm:$0xff] %v314_v41 }
 0x13d PF: > { %s17_s19 = sadd.s32 1, %s523_s19   ;;  %s606_s17 = smov %s519_s18 }
 0x13e   : > { %p14_p8 = scmp.ge.s32.totalorder %s17_s19, 4   ;;  %s607_s18 = smov %s609_s3 }
 0x140   :  { %16 = sbr.rel (!%p14_p8) target bundleno = 4 (0x4), region = 71 }
 0x145   :  { %345 = vsyncpa [#allocation6], 1 }
 0x146   :  { %347 = vsyncpa [#allocation6 + $0x1], 1 }

</bundles_post_ra>
